<compile_context>
chip_gen: v6e
topology: v6e:2x2x1
jax: 0.10.0
libtpu: 0.0.40
codegen_flags: <defaults>
</compile_context>

<pallas_src>
import math

import jax
import jax.numpy as jnp
from jax import lax
from jax.experimental import pallas as pl
from jax.experimental.pallas import tpu as pltpu

EPS = 1e-12

# Contract the last dim of both operands: A @ B^T without materializing B^T.
_NT_DIMS = (((1,), (1,)), ((), ()))


def _round_up(x, m):
    return ((x + m - 1) // m) * m


def _dual_softmax(z):
    """softmax(z, -1) and softmax(-z, -1), computed in f32."""
    m_p = jnp.max(z, axis=-1, keepdims=True)
    e_p = jnp.exp(z - m_p)
    p = e_p * pl.reciprocal(jnp.sum(e_p, axis=-1, keepdims=True), approx=False)
    m_n = jnp.max(-z, axis=-1, keepdims=True)
    e_n = jnp.exp(-z - m_n)
    n = e_n * pl.reciprocal(jnp.sum(e_n, axis=-1, keepdims=True), approx=False)
    return p, n


def _hedgehog_kernel(q_ref, k_ref, wq_ref, wk_ref, o_ref, phi_q_ref):
    # q_ref: (tm, D) bf16    k_ref: (tn, D) bf16    wq_ref/wk_ref: (D, F) bf16
    # o_ref: (tm, tn) out_dtype    phi_q_ref: (tm, 2F) bf16 scratch
    n_idx = pl.program_id(3)

    # phi_q of the current (h, b, m) tile is reused across all N tiles
    # (n is the innermost grid axis and marked "arbitrary").
    @pl.when(n_idx == 0)
    def _():
        zq = jnp.dot(q_ref[...], wq_ref[...], preferred_element_type=jnp.float32)
        p_q, n_q = _dual_softmax(zq)
        phi_q = jnp.maximum(jnp.concatenate([p_q, n_q], axis=-1), EPS)
        phi_q_ref[...] = phi_q.astype(phi_q_ref.dtype)

    # TODO(synk): optionally cache phi_k for the whole (h, b) row in an
    # (Np, 2F) bf16 scratch (m axis would then need to be "arbitrary") once the
    # bf16 output write no longer hides the per-m-tile recompute.
    zk = jnp.dot(k_ref[...], wk_ref[...], preferred_element_type=jnp.float32)
    p_k, n_k = _dual_softmax(zk)
    phi_k = jnp.maximum(jnp.concatenate([p_k, n_k], axis=-1), EPS).astype(jnp.bfloat16)

    # Single 2F-deep contraction: phi_q @ phi_k^T with f32 accumulation.
    acc = lax.dot_general(phi_q_ref[...], phi_k, _NT_DIMS,
                          preferred_element_type=jnp.float32)
    o_ref[...] = acc.astype(o_ref.dtype)


def trainable_hedgehog_forward(q, k, wq_layers, wk_layers, layer_idx,
                               *, tile_m=1024, tile_n=1024,
                               out_dtype=jnp.bfloat16,
                               vmem_limit_bytes=48 * 1024 * 1024):
    """
    q:         (B, H, M, D)  float32
    k:         (B, H, N, D)  float32
    wq_layers: (L, H, D, F)  float32  (stacked HedgehogFeatureMap weights for q)
    wk_layers: (L, H, D, F)  float32  (stacked HedgehogFeatureMap weights for k)
    returns:   (B, H, M, N)  out_dtype (default bf16; accumulation is f32)

    v7x-safe defaults. On v5e/v6e (128 MiB VMEM) pass e.g. tile_m=2048 and
    vmem_limit_bytes=96<<20 to further cut k re-read traffic.
    """
    B, H, M, D = q.shape
    N = k.shape[2]
    F = wq_layers.shape[-1]

    # Glue: pick the layer's parameters (plain JAX indexing), cast to bf16 so
    # the MXU runs its native bf16 path and HBM->VMEM DMA bytes are halved.
    wq = wq_layers[layer_idx].astype(jnp.bfloat16)   # (H, D, F)
    wk = wk_layers[layer_idx].astype(jnp.bfloat16)   # (H, D, F)
    qb = q.astype(jnp.bfloat16)
    kb = k.astype(jnp.bfloat16)

    # bf16 M tiles: multiple of 16 (sublane packing); N tiles: multiple of 128
    # (lane-dense output stores). Pad M/N up to the tile instead of falling
    # back to a full-dimension block (which could exceed v7x's 64 MiB VMEM).
    tm = min(tile_m, _round_up(M, 16))
    tn = min(tile_n, _round_up(N, 128))
    Mp = _round_up(M, tm)
    Np = _round_up(N, tn)
    if Mp != M:
        qb = jnp.pad(qb, ((0, 0), (0, 0), (0, Mp - M), (0, 0)))
    if Np != N:
        kb = jnp.pad(kb, ((0, 0), (0, 0), (0, Np - N), (0, 0)))

    # h outermost: the (D, F) weight block index is constant along all inner
    # axes, so the weights are fetched only H times. n innermost + "arbitrary"
    # so the phi_q scratch cache is valid across the N loop (and under
    # megacore sharding of the parallel axes).
    grid = (H, B, Mp // tm, Np // tn)

    out = pl.pallas_call(
        _hedgehog_kernel,
        out_shape=jax.ShapeDtypeStruct((B, H, Mp, Np), out_dtype),
        grid_spec=pltpu.PrefetchScalarGridSpec(
            num_scalar_prefetch=0,
            grid=grid,
            in_specs=[
                pl.BlockSpec((None, None, tm, D), lambda h, b, m, n: (b, h, m, 0)),  # q
                pl.BlockSpec((None, None, tn, D), lambda h, b, m, n: (b, h, n, 0)),  # k
                pl.BlockSpec((None, D, F), lambda h, b, m, n: (h, 0, 0)),            # wq[h]
                pl.BlockSpec((None, D, F), lambda h, b, m, n: (h, 0, 0)),            # wk[h]
            ],
            out_specs=pl.BlockSpec((None, None, tm, tn),
                                   lambda h, b, m, n: (b, h, m, n)),
            scratch_shapes=[
                pltpu.VMEM((tm, 2 * F), jnp.bfloat16),   # phi_q cache (both halves)
            ],
        ),
        compiler_params=pltpu.CompilerParams(
            dimension_semantics=("parallel", "parallel", "parallel", "arbitrary"),
            vmem_limit_bytes=vmem_limit_bytes,
        ),
    )(qb, kb, wq, wk)

    if Mp != M or Np != N:
        out = out[:, :, :M, :N]
    return out


def kaiming_uniform_init(key, shape):
    """Mimic torch.nn.init.kaiming_uniform_ (a=0, fan_in, leaky_relu) for an
    (H, D, F) tensor: fan_in = D * F (PyTorch's fan-in rule for ndim>2)."""
    fan_in = shape[1] * math.prod(shape[2:])
    gain = math.sqrt(2.0)
    bound = gain * math.sqrt(3.0 / fan_in)
    return jax.random.uniform(key, shape, jnp.float32, minval=-bound, maxval=bound)


def reference_forward(q, k, wq_layers, wk_layers, layer_idx):
    """Pure-JAX (f32) reference matching the PyTorch semantics."""
    wq = wq_layers[layer_idx]
    wk = wk_layers[layer_idx]

    def feat(x, w):
        z = jnp.einsum('hdf,bhld->bhlf', w, x)
        phi = jnp.concatenate(
            [jax.nn.softmax(z, axis=-1), jax.nn.softmax(-z, axis=-1)], axis=-1)
        return jnp.maximum(phi, EPS)

    phi_q = feat(q, wq)
    phi_k = feat(k, wk)
    return jnp.einsum('bhmd,bhnd->bhmn', phi_q, phi_k)


def _check(out, ref, atol, rtol, tag):
    out_f32 = out.astype(jnp.float32)
    err = jnp.max(jnp.abs(out_f32 - ref))
    assert out.shape == ref.shape, f"{tag}: shape mismatch {out.shape} vs {ref.shape}"
    assert jnp.allclose(out_f32, ref, atol=atol, rtol=rtol), \
        f"{tag}: mismatch vs reference, max abs err={err}"


if __name__ == "__main__":
    num_feature_maps = 3
    layer_idx = 1
    key = jax.random.PRNGKey(0)

    # ---- Test 1: small, module-consistent shapes -------------------------
    B, H, M, N, D, F = 2, 4, 8, 8, 32, 32
    kq, kk, kwq, kwk = jax.random.split(key, 4)
    q = jax.random.normal(kq, (B, H, M, D), jnp.float32)
    k = jax.random.normal(kk, (B, H, N, D), jnp.float32)
    wq_layers = jnp.stack(
        [kaiming_uniform_init(jax.random.fold_in(kwq, i), (H, D, F))
         for i in range(num_feature_maps)])
    wk_layers = jnp.stack(
        [kaiming_uniform_init(jax.random.fold_in(kwk, i), (H, D, F))
         for i in range(num_feature_maps)])

    out = trainable_hedgehog_forward(q, k, wq_layers, wk_layers, layer_idx)
    out = jax.block_until_ready(out)
    ref = reference_forward(q, k, wq_layers, wk_layers, layer_idx)
    # Tolerance accounts for bf16 MXU operands / bf16 output vs the f32 ref.
    _check(out, ref, atol=2e-3, rtol=3e-2, tag="small")

    # ---- Test 2: non-divisible M/N, multi-tile grid (exercises padding,
    #              lane-dense tiles, and the n==0 phi_q cache) --------------
    B2, H2, M2, N2, D2, F2 = 1, 2, 96, 320, 64, 64
    kq2, kk2, kwq2, kwk2 = jax.random.split(jax.random.PRNGKey(1), 4)
    q2 = jax.random.normal(kq2, (B2, H2, M2, D2), jnp.float32)
    k2 = jax.random.normal(kk2, (B2, H2, N2, D2), jnp.float32)
    wq2 = jnp.stack(
        [kaiming_uniform_init(jax.random.fold_in(kwq2, i), (H2, D2, F2))
         for i in range(num_feature_maps)])
    wk2 = jnp.stack(
        [kaiming_uniform_init(jax.random.fold_in(kwk2, i), (H2, D2, F2))
         for i in range(num_feature_maps)])

    out2 = trainable_hedgehog_forward(q2, k2, wq2, wk2, layer_idx,
                                      tile_m=64, tile_n=128)
    out2 = jax.block_until_ready(out2)
    ref2 = reference_forward(q2, k2, wq2, wk2, layer_idx)
    _check(out2, ref2, atol=1e-3, rtol=3e-2, tag="tiled")

    print("KERNEL_OK")
</pallas_src>

<mosaic_0001>
module attributes {stable_mosaic.version = 11 : i64} {
  func.func @_hedgehog_kernel(%arg0: i32, %arg1: i32, %arg2: i32, %arg3: i32, %arg4: memref<1x1x16x32xbf16, #tpu.memory_space<vmem>>, %arg5: memref<1x1x128x32xbf16, #tpu.memory_space<vmem>>, %arg6: memref<1x32x32xbf16, #tpu.memory_space<vmem>>, %arg7: memref<1x32x32xbf16, #tpu.memory_space<vmem>>, %arg8: memref<1x1x16x128xbf16, #tpu.memory_space<vmem>>, %arg9: memref<16x64xbf16, #tpu.memory_space<vmem>>) attributes {dimension_semantics = [#tpu.dimension_semantics<parallel>, #tpu.dimension_semantics<parallel>, #tpu.dimension_semantics<parallel>, #tpu.dimension_semantics<arbitrary>], iteration_bounds = array<i64: 4, 2, 1, 1>, scalar_prefetch = 0 : i64, scratch_operands = 1 : i64, tpu.core_type = #tpu.core_type<tc>, window_params = [{transform_indices = @transform_0, window_bounds = array<i64: 1, 1, 16, 32>}, {transform_indices = @transform_1, window_bounds = array<i64: 1, 1, 128, 32>}, {transform_indices = @transform_2, window_bounds = array<i64: 1, 32, 32>}, {transform_indices = @transform_3, window_bounds = array<i64: 1, 32, 32>}, {transform_indices = @transform_4, window_bounds = array<i64: 1, 1, 16, 128>}]} {
    %c0_i32 = arith.constant 0 : i32
    %0 = arith.cmpi eq, %arg3, %c0_i32 : i32
    %1 = arith.extui %0 : i1 to i32
    %c0_i32_0 = arith.constant 0 : i32
    %2 = arith.cmpi ne, %1, %c0_i32_0 : i32
    scf.if %2 {
      %c0_21 = arith.constant 0 : index
      %c0_22 = arith.constant 0 : index
      %c0_23 = arith.constant 0 : index
      %c0_24 = arith.constant 0 : index
      %42 = vector.load %arg4[%c0_21, %c0_22, %c0_23, %c0_24] : memref<1x1x16x32xbf16, #tpu.memory_space<vmem>>, vector<1x1x16x32xbf16>
      %43 = vector.shape_cast %42 : vector<1x1x16x32xbf16> to vector<16x32xbf16>
      %c0_25 = arith.constant 0 : index
      %c0_26 = arith.constant 0 : index
      %c0_27 = arith.constant 0 : index
      %44 = vector.load %arg6[%c0_25, %c0_26, %c0_27] : memref<1x32x32xbf16, #tpu.memory_space<vmem>>, vector<1x32x32xbf16>
      %45 = vector.shape_cast %44 : vector<1x32x32xbf16> to vector<32x32xbf16>
      %cst_28 = arith.constant dense<0.000000e+00> : vector<16x32xf32>
      %46 = tpu.matmul %43, %45, %cst_28 {dimension_numbers = #tpu.dot_dimension_numbers<[1], [0], [0], [1], [0, 0, 1, 1], [], []>} : vector<16x32xbf16>, vector<32x32xbf16>, vector<16x32xf32> -> vector<16x32xf32>
      %cst_29 = arith.constant dense<0xFF800000> : vector<16xf32>
      %47 = vector.multi_reduction <maximumf>, %46, %cst_29 [1] : vector<16x32xf32> to vector<16xf32>
      %48 = vector.shape_cast %47 : vector<16xf32> to vector<16x1xf32>
      %49 = vector.broadcast %48 : vector<16x1xf32> to vector<16x32xf32>
      %50 = arith.subf %46, %49 : vector<16x32xf32>
      %51 = math.exp %50 : vector<16x32xf32>
      %cst_30 = arith.constant dense<0.000000e+00> : vector<16xf32>
      %52 = vector.multi_reduction <add>, %51, %cst_30 [1] : vector<16x32xf32> to vector<16xf32>
      %53 = vector.shape_cast %52 : vector<16xf32> to vector<16x1xf32>
      %54 = tpu.reciprocal %53 : vector<16x1xf32> -> vector<16x1xf32>
      %55 = vector.broadcast %54 : vector<16x1xf32> to vector<16x32xf32>
      %56 = arith.mulf %51, %55 : vector<16x32xf32>
      %cst_31 = arith.constant 0.000000e+00 : f32
      %57 = vector.broadcast %cst_31 : f32 to vector<16x32xf32>
      %58 = arith.subf %57, %46 : vector<16x32xf32>
      %cst_32 = arith.constant dense<0xFF800000> : vector<16xf32>
      %59 = vector.multi_reduction <maximumf>, %58, %cst_32 [1] : vector<16x32xf32> to vector<16xf32>
      %60 = vector.shape_cast %59 : vector<16xf32> to vector<16x1xf32>
      %cst_33 = arith.constant 0.000000e+00 : f32
      %61 = vector.broadcast %cst_33 : f32 to vector<16x32xf32>
      %62 = arith.subf %61, %46 : vector<16x32xf32>
      %63 = vector.broadcast %60 : vector<16x1xf32> to vector<16x32xf32>
      %64 = arith.subf %62, %63 : vector<16x32xf32>
      %65 = math.exp %64 : vector<16x32xf32>
      %cst_34 = arith.constant dense<0.000000e+00> : vector<16xf32>
      %66 = vector.multi_reduction <add>, %65, %cst_34 [1] : vector<16x32xf32> to vector<16xf32>
      %67 = vector.shape_cast %66 : vector<16xf32> to vector<16x1xf32>
      %68 = tpu.reciprocal %67 : vector<16x1xf32> -> vector<16x1xf32>
      %69 = vector.broadcast %68 : vector<16x1xf32> to vector<16x32xf32>
      %70 = arith.mulf %65, %69 : vector<16x32xf32>
      %71 = tpu.concatenate %56, %70 in 1 : vector<16x32xf32>, vector<16x32xf32> -> vector<16x64xf32>
      %cst_35 = arith.constant 9.99999996E-13 : f32
      %72 = vector.broadcast %cst_35 : f32 to vector<16x64xf32>
      %73 = arith.maximumf %71, %72 : vector<16x64xf32>
      %74 = arith.truncf %73 : vector<16x64xf32> to vector<16x64xbf16>
      %c0_36 = arith.constant 0 : index
      %c0_37 = arith.constant 0 : index
      %75 = vector.load %arg9[%c0_36, %c0_37] : memref<16x64xbf16, #tpu.memory_space<vmem>>, vector<16x64xbf16>
      tpu.vector_store %arg9[%c0_36, %c0_37], %74 {strides = array<i32>} : memref<16x64xbf16, #tpu.memory_space<vmem>>, vector<16x64xbf16>,
    } else {
    }
    %c0 = arith.constant 0 : index
    %c0_1 = arith.constant 0 : index
    %c0_2 = arith.constant 0 : index
    %c0_3 = arith.constant 0 : index
    %3 = vector.load %arg5[%c0, %c0_1, %c0_2, %c0_3] : memref<1x1x128x32xbf16, #tpu.memory_space<vmem>>, vector<1x1x128x32xbf16>
    %4 = vector.shape_cast %3 : vector<1x1x128x32xbf16> to vector<128x32xbf16>
    %c0_4 = arith.constant 0 : index
    %c0_5 = arith.constant 0 : index
    %c0_6 = arith.constant 0 : index
    %5 = vector.load %arg7[%c0_4, %c0_5, %c0_6] : memref<1x32x32xbf16, #tpu.memory_space<vmem>>, vector<1x32x32xbf16>
    %6 = vector.shape_cast %5 : vector<1x32x32xbf16> to vector<32x32xbf16>
    %cst = arith.constant dense<0.000000e+00> : vector<128x32xf32>
    %7 = tpu.matmul %4, %6, %cst {dimension_numbers = #tpu.dot_dimension_numbers<[1], [0], [0], [1], [0, 0, 1, 1], [], []>} : vector<128x32xbf16>, vector<32x32xbf16>, vector<128x32xf32> -> vector<128x32xf32>
    %cst_7 = arith.constant dense<0xFF800000> : vector<128xf32>
    %8 = vector.multi_reduction <maximumf>, %7, %cst_7 [1] : vector<128x32xf32> to vector<128xf32>
    %9 = vector.shape_cast %8 : vector<128xf32> to vector<128x1xf32>
    %10 = vector.broadcast %9 : vector<128x1xf32> to vector<128x32xf32>
    %11 = arith.subf %7, %10 : vector<128x32xf32>
    %12 = math.exp %11 : vector<128x32xf32>
    %cst_8 = arith.constant dense<0.000000e+00> : vector<128xf32>
    %13 = vector.multi_reduction <add>, %12, %cst_8 [1] : vector<128x32xf32> to vector<128xf32>
    %14 = vector.shape_cast %13 : vector<128xf32> to vector<128x1xf32>
    %15 = tpu.reciprocal %14 : vector<128x1xf32> -> vector<128x1xf32>
    %16 = vector.broadcast %15 : vector<128x1xf32> to vector<128x32xf32>
    %17 = arith.mulf %12, %16 : vector<128x32xf32>
    %cst_9 = arith.constant 0.000000e+00 : f32
    %18 = vector.broadcast %cst_9 : f32 to vector<128x32xf32>
    %19 = arith.subf %18, %7 : vector<128x32xf32>
    %cst_10 = arith.constant dense<0xFF800000> : vector<128xf32>
    %20 = vector.multi_reduction <maximumf>, %19, %cst_10 [1] : vector<128x32xf32> to vector<128xf32>
    %21 = vector.shape_cast %20 : vector<128xf32> to vector<128x1xf32>
    %cst_11 = arith.constant 0.000000e+00 : f32
    %22 = vector.broadcast %cst_11 : f32 to vector<128x32xf32>
    %23 = arith.subf %22, %7 : vector<128x32xf32>
    %24 = vector.broadcast %21 : vector<128x1xf32> to vector<128x32xf32>
    %25 = arith.subf %23, %24 : vector<128x32xf32>
    %26 = math.exp %25 : vector<128x32xf32>
    %cst_12 = arith.constant dense<0.000000e+00> : vector<128xf32>
    %27 = vector.multi_reduction <add>, %26, %cst_12 [1] : vector<128x32xf32> to vector<128xf32>
    %28 = vector.shape_cast %27 : vector<128xf32> to vector<128x1xf32>
    %29 = tpu.reciprocal %28 : vector<128x1xf32> -> vector<128x1xf32>
    %30 = vector.broadcast %29 : vector<128x1xf32> to vector<128x32xf32>
    %31 = arith.mulf %26, %30 : vector<128x32xf32>
    %32 = tpu.concatenate %17, %31 in 1 : vector<128x32xf32>, vector<128x32xf32> -> vector<128x64xf32>
    %cst_13 = arith.constant 9.99999996E-13 : f32
    %33 = vector.broadcast %cst_13 : f32 to vector<128x64xf32>
    %34 = arith.maximumf %32, %33 : vector<128x64xf32>
    %35 = arith.truncf %34 : vector<128x64xf32> to vector<128x64xbf16>
    %c0_14 = arith.constant 0 : index
    %c0_15 = arith.constant 0 : index
    %36 = vector.load %arg9[%c0_14, %c0_15] : memref<16x64xbf16, #tpu.memory_space<vmem>>, vector<16x64xbf16>
    %cst_16 = arith.constant dense<0.000000e+00> : vector<16x128xf32>
    %37 = tpu.matmul %36, %35, %cst_16 {dimension_numbers = #tpu.dot_dimension_numbers<[1], [1], [0], [0], [0, 0, 1, 0], [], []>} : vector<16x64xbf16>, vector<128x64xbf16>, vector<16x128xf32> -> vector<16x128xf32>
    %38 = arith.truncf %37 : vector<16x128xf32> to vector<16x128xbf16>
    %c0_17 = arith.constant 0 : index
    %c0_18 = arith.constant 0 : index
    %c0_19 = arith.constant 0 : index
    %c0_20 = arith.constant 0 : index
    %39 = vector.load %arg8[%c0_17, %c0_18, %c0_19, %c0_20] : memref<1x1x16x128xbf16, #tpu.memory_space<vmem>>, vector<1x1x16x128xbf16>
    %40 = vector.shape_cast %39 : vector<1x1x16x128xbf16> to vector<16x128xbf16>
    %41 = vector.shape_cast %38 : vector<16x128xbf16> to vector<1x1x16x128xbf16>
    tpu.vector_store %arg8[%c0_17, %c0_18, %c0_19, %c0_20], %41 {strides = array<i32>} : memref<1x1x16x128xbf16, #tpu.memory_space<vmem>>, vector<1x1x16x128xbf16>,
    return
  }
  func.func @transform_0(%arg0: i32, %arg1: i32, %arg2: i32, %arg3: i32) -> (i32, i32, i32, i32) {
    %c0_i32 = arith.constant 0 : i32
    %c0_i32_0 = arith.constant 0 : i32
    return %arg1, %arg0, %arg2, %c0_i32 : i32, i32, i32, i32
  }
  func.func @transform_1(%arg0: i32, %arg1: i32, %arg2: i32, %arg3: i32) -> (i32, i32, i32, i32) {
    %c0_i32 = arith.constant 0 : i32
    %c0_i32_0 = arith.constant 0 : i32
    return %arg1, %arg0, %arg3, %c0_i32 : i32, i32, i32, i32
  }
  func.func @transform_2(%arg0: i32, %arg1: i32, %arg2: i32, %arg3: i32) -> (i32, i32, i32) {
    %c0_i32 = arith.constant 0 : i32
    %c0_i32_0 = arith.constant 0 : i32
    %c0_i32_1 = arith.constant 0 : i32
    return %arg0, %c0_i32, %c0_i32_0 : i32, i32, i32
  }
  func.func @transform_3(%arg0: i32, %arg1: i32, %arg2: i32, %arg3: i32) -> (i32, i32, i32) {
    %c0_i32 = arith.constant 0 : i32
    %c0_i32_0 = arith.constant 0 : i32
    %c0_i32_1 = arith.constant 0 : i32
    return %arg0, %c0_i32, %c0_i32_0 : i32, i32, i32
  }
  func.func @transform_4(%arg0: i32, %arg1: i32, %arg2: i32, %arg3: i32) -> (i32, i32, i32, i32) {
    %c0_i32 = arith.constant 0 : i32
    return %arg1, %arg0, %arg2, %arg3 : i32, i32, i32, i32
  }
}

</mosaic_0001>

<bundles_post_ra>
// kernel: tpu_custom_call.1
= control target key start
LH: loop header
LB: loop body
LE: loop exit
PB: predicated region body
PF: predicated region fallthrough
CT: control target
= control target key end

     0   :  { %9 = vsyncpa [#allocation4], 0  ;;  %s2624_s0 = inlined_call_operand.vmem [shape: bf16[2,4,16,32], index: 0, kind: input, shape index: {}]   ;;  %s2625_s1 = inlined_call_operand.vmem [shape: bf16[2,4,128,32], index: 1, kind: input, shape index: {}]   ;;  %s2626_s2 = inlined_call_operand.vmem [shape: bf16[4,32,32], index: 2, kind: input, shape index: {}]   ;;  %s2627_s3 = inlined_call_operand.vmem [shape: bf16[4,32,32], index: 3, kind: input, shape index: {}]   ;;  %s2628_s4 = inlined_call_operand.hbm [shape: bf16[2,4,16,128], index: 4, kind: output, shape index: {}]  }
   0x1   :  { %11 = vsyncpa [#allocation4 + $0x1], 0  ;;  %s1942_s15 = smov 0   ;;  %s1944_s16 = smov 0  }
   0x2   :  { %s1946_s17 = smov 0   ;;  %s1948_s18 = smov 0  }
   0x3   :  { %s1950_s19 = smov 0   ;;  %s1952_s20 = smov 0  }
   0x4   :  { %s1954_s21 = smov 0   ;;  %s1956_s22 = smov 0  }
   0x5 LB: > { %2633 = sst [smem:[#allocation6_spill]] %s1901_s20  ;;  %s1407_s23 = sadd.s32 4294967295, %s1909_s22   ;;  %s1909_s22 = sphi %s1956_s22, %s17_s22   ;;  %s1905_s21 = sphi %s1954_s21, %s2642_s21   ;;  %s1901_s20 = sphi %s1952_s20, %s2641_s20   ;;  %s1897_s19 = sphi %s1950_s19, %s2640_s19   ;;  %s1893_s18 = sphi %s1948_s18, %s2639_s18   ;;  %s1889_s17 = sphi %s1946_s17, %s2645_s17   ;;  %s1885_s16 = sphi %s1944_s16, %s2644_s16   ;;  %s1881_s15 = sphi %s1942_s15, %s2643_s15  }
   0x6   : > { %2634 = sst [smem:[#allocation7_spill]] %s1905_s21  ;;  %s1408_s24 = sadd.s32 4294967294, %s1909_s22  }
   0x7   : > { %s39_s25 = sadd.s32 1, %s1901_s20  ;;  %s43_s26 = sadd.s32 1, %s1905_s21 }
   0x8   : > { %p41_p0 = scmp.ge.s32.totalorder %s39_s25, 2  ;;  %p178_p1 = scmp.ne.s32.totalorder %s1889_s17, %s1885_s16 }
   0x9   : > { %p179_p2 = scmp.eq.s32.totalorder %s1407_s23, 7  ;;  %p184_p5 = scmp.ne.s32.totalorder %s1885_s16, %s1881_s15 }
   0xa   : > { %s2647_s25 = smov (%p41_p0, %s39_s25), 0  ;;  %s2649_s26 = smov (!%p41_p0, %s43_s26), %s1905_s21 }
   0xb   : > { %2635 = sst [smem:[#allocation8_spill]] %s2647_s25  ;;  %s159_s27 = ssub.s32 %s1901_s20, %s2647_s25 }
   0xc   : > { %p1993_p3 = por %p179_p2, %p178_p1  ;;  %p45_p4 = scmp.ge.s32.totalorder %s2649_s26, 4 }
   0xd   : > { %p185_p6 = scmp.eq.s32.totalorder %s1408_s24, 7  ;;  %p1411_p7 = scmp.ge.s32.totalorder %s1909_s22, 1 }
   0xe   : > { %s2651_s26 = smov (%p45_p4, %s2649_s26), 0  ;;  %p253_p9 = scmp.lt.s32.totalorder %s1909_s22, 9 }
   0xf   : > { %2637 = sst [smem:[#allocation9_spill]] %s2651_s26  ;;  %p2002_p8 = por %p185_p6, %p184_p5 }
  0x10   : > { %s160_s30 = ssub.s32 %s1905_s21, %s2651_s26  ;;  %s168_s5 = sadd.s32 1, %s1889_s17 }
  0x11   : > { %s161_s6 = sor.u32 %s160_s30, %s159_s27  ;;  %p254_p10 = pnand %p1411_p7, %p253_p9 }
  0x12   : > { %p166_p11 = scmp.eq.s32.totalorder %s161_s6, 0  ;;  %p311_p12 = scmp.lt.s32.totalorder (!%p254_p10), %s1893_s18, 1 }
  0x13   : > { %257 = sbr.rel (%p254_p10) target bundleno = 1064 (0x428), region = 36  ;;  %p313_p13 = scmp.lt.s32.totalorder (!%p254_p10), %s1897_s19, 3 }
  0x14   : > { %s2011_s7 = scalar_select %p166_p11, %s1889_s17, %s168_s5  }
  0x15   : > { %s1913_s20 = smov (!%p254_p10), 32   ;;  %s1452_s26 = sshll.u32 (!%p254_p10), %s1897_s19, 1 }
  0x18   : > { %v1911_v0 = vmov 0.0   ;;  %vm1912_vm0 = vmmov 0   ;;  %s312_s8 = scalar_select %p311_p12, %s1893_s18, 1  ;;  %vm377_vm1 = vcmask 261120   ;;  %vm1164_vm2 = vcmask 523264  }
  0x19   : > { %1490 = vmatprep.subr.bf16.mxu1 %v1911_v0  ;;  %1494 = vmatprep.mubr.msk.bf16.mxu1 %vm1912_vm0, %v1911_v0  ;;  %s314_s9 = scalar_select %p313_p13, %s1897_s19, 3  ;;  %vm488_vm3 = vcmask 519168  }
  0x1a   : > { %1518 = vmatprep.subr.bf16.mxu0 %v1911_v0  ;;  %1534 = vmatprep.mubr.msk.bf16.mxu0 %vm1912_vm0, %v1911_v0  ;;  %s1417_s10 = sshll.u32 %s312_s8, 6  ;;  %s1414_s11 = sshll.u32 %s312_s8, 3 }
  0x1b   : > { %s1416_s12 = sshll.u32 %s314_s9, 4  ;;  %s1413_s13 = sshll.u32 %s314_s9, 1 }
  0x1c   : > { %s334_s14 = sadd.s32 %s1417_s10, %s1416_s12  ;;  %s342_s27 = scalar_lea.vmem %s2626_s2, %s1416_s12 }
  0x1d   : > { %s1418_s30 = sshll.u32 %s334_s14, 2  ;;  %v1659_v1 = vld [vmem:[%s342_s27 + $0x8] sm:$0xff]   ;;  %s320_s5 = sadd.s32 %s1414_s11, %s1413_s13  ;;  %v1660_v2 = vld [vmem:[%s342_s27] sm:$0xff]  }
  0x1e   : > { %s2027_s25 = scalar_lea.vmem %s2625_s1, %s1418_s30  ;;  %s1415_s21 = sshll.u32 %s320_s5, 2  ;;  %1491 = vmatpush3.bf16.msra.mxu1 %v1659_v1 }
  0x1f   : > { %s322_s10 = scalar_lea.vmem %s2624_s0, %s1415_s21  ;;  %s347_s14 = scalar_lea.vmem %s2627_s3, %s1416_s12  ;;  %1492 = vmatprep.subr.bf16.mxu1 %v1911_v0  ;;  %v1664_v5 = vld [vmem:[%s2027_s25] sm:$0xff]   ;;  %v1665_v7 = vld [vmem:[%s2027_s25 + $0x8] sm:$0xff]   ;;  %v1666_v8 = vld [vmem:[%s2027_s25 + $0x10] sm:$0xff]  }
  0x20   : > { %v1662_v3 = vld [vmem:[%s347_s14 + $0x8] sm:$0xff]   ;;  %v1661_v4 = vld [vmem:[%s322_s10] sm:$0xff]   ;;  %v1667_v9 = vld [vmem:[%s2027_s25 + $0x18] sm:$0xff]   ;;  %s307_s21 = sand.u32 1, %s1885_s16   ;;  %s1453_s11 = sshll.u32 %s1893_s18, 3 }
  0x21   : > { %v1663_v6 = vld [vmem:[%s347_s14] sm:$0xff]   ;;  %v1669_v11 = vld [vmem:[%s2027_s25 + $0x28] sm:$0xff]   ;;  %v1670_v12 = vld [vmem:[%s2027_s25 + $0x30] sm:$0xff]   ;;  %s1259_s12 = sadd.s32 %s1453_s11, %s1452_s26  ;;  %s2573_s18 = scalar_lea.sflag [#allocation4], %s307_s21 }
  0x22   : > { %1493 = vmatpush3.bf16.msra.mxu1 %v1660_v2  ;;  %v1668_v10 = vld [vmem:[%s2027_s25 + $0x20] sm:$0xff]   ;;  %v1671_v13 = vld [vmem:[%s2027_s25 + $0x38] sm:$0xff]   ;;  %s1412_s25 = sshll.u32 %s307_s21, 3  ;;  %s1454_s27 = sshll.u32 %s1259_s12, 6 }
  0x23   : > { %1498 = vmatprep.subr.bf16.mxu1 %v1662_v3  ;;  %s309_s13 = scalar_lea.vmem [#allocation3], %s1412_s25  ;;  %s2571_s6 = scalar_lea.hbm %s2628_s4, %s1454_s27 }
  0x24   : > { %s1262_s24 = sshll.u32 %s309_s13, 4  ;;  %s1914_s8 = smov [#allocation3]   ;;  %s2566_s24 = int_to_ptr.vmem [resolvable:$true] %s1262_s24 }
  0x25   : > { %1495 = vmatmul.mubr.msk.bf16.vlgmr.msra.gmra.mxu1 %vm377_vm1, %v1661_v4  ;;  %s1817_s19 = scalar_lea.vmem %s2566_s24, 128  ;;  %s1821_s9 = sshll.u32 %s1914_s8, 4  ;;  %s1822_s9 = int_to_ptr.vmem [resolvable:$false] %s1821_s9 }
  0x26   : > { %1499 = vmatpush3.bf16.msra.mxu1 %v1662_v3  ;;  %1502 = vmatprep.mubr.msk.bf16.mxu1 %vm377_vm1, %v1664_v5  ;;  %p1818_p0 = scmp.ne.s32.totalorder %s2566_s24, %s1817_s19  ;;  %s1823_s10 = scalar_lea.vmem %s1822_s9, 256 }
  0x27   : > { %1500 = vmatprep.subr.bf16.mxu1 %v1663_v6  ;;  %p1824_p4 = scmp.lt.s32.totalorder %s2566_s24, %s1822_s9  ;;  %p1825_p5 = scmp.lt.s32.totalorder %s1823_s10, %s1817_s19 }
  0x28   : > { %p1819_p1 = pnand %p1818_p0, %p1993_p3 }
  0x29   : > { %p1826_p6 = por %p1825_p5, %p1824_p4 }
  0x2a   : > { %1501 = vmatpush3.bf16.msra.mxu1 %v1663_v6  ;;  %p1820_p2 = pneg %p1819_p1 }
  0x2c   : > { %p1827_p7 = pnand %p1826_p6, %p1820_p2 }
  0x2d   : > { %1503 = vmatmul.mubr.msk.bf16.vlgmr.msra.gmra.mxu1 %vm377_vm1, %v1665_v7 }
  0x2e   : > { %1506 = vmatprep.mubr.msk.bf16.mxu1 %vm377_vm1, %v1666_v8 }
  0x35   : > { %1507 = vmatmul.mubr.msk.bf16.gmra.mxu1 %vm377_vm1, %v1667_v9 }
  0x36   : > { %1510 = vmatprep.mubr.msk.bf16.mxu1 %vm377_vm1, %v1668_v10 }
  0x3d   : > { %1511 = vmatmul.mubr.msk.bf16.gmra.mxu1 %vm377_vm1, %v1669_v11 }
  0x3e   : > { %1514 = vmatprep.mubr.msk.bf16.mxu1 %vm377_vm1, %v1670_v12 }
  0x45   : > { %1515 = vmatmul.mubr.msk.bf16.gmra.mxu1 %vm377_vm1, %v1671_v13 }
  0xe5   : > { %v2053_v14 = vpop.f32.mrf.mxu1 }
  0xe6   : > { %v444_v61 = vsub.f32 0.0, %v2053_v14 }
  0xe7   : > { %v1496_v15 = vpop.f32.mrf.mxu1 }
  0xe8   : > { %v446_v62 = vsel %vm377_vm1, %v444_v61, -inf }
  0xe9   : > { %v2055_v16 = vpop.f32.mrf.mxu1 }
  0xea   : > { %v445_v2 = vsub.f32 0.0, %v2055_v16 }
  0xeb   : > { %v1497_v17 = vpop.f32.mrf.mxu1 }
  0xec   : > { %v449_v4 = vsel %vm377_vm1, %v445_v2, -inf }
  0xed   : > { %v2057_v18 = vpop.f32.mrf.mxu1 }
  0xee   : > { %v863_v56 = vsub.f32 0.0, %v2057_v18 }
  0xef   : > { %v2059_v19 = vpop.f32.mrf.mxu1 }
  0xf0   : > { %v883_v60 = vsel %vm377_vm1, %v863_v56, -inf  ;;  %v861_v1 = vsub.f32 0.0, %v2059_v19 }
  0xf1   : > { %v2061_v20 = vpop.f32.mrf.mxu1 }
  0xf2   : > { %v864_v55 = vsub.f32 0.0, %v2061_v20  ;;  %v877_v3 = vsel %vm377_vm1, %v861_v1, -inf }
  0xf3   : > { %v2063_v21 = vpop.f32.mrf.mxu1 }
  0xf4   : > { %v886_v59 = vsel %vm377_vm1, %v864_v55, -inf  ;;  %v862_v5 = vsub.f32 0.0, %v2063_v21 }
  0xf5   : > { %v2065_v22 = vpop.f32.mrf.mxu1 }
  0xf6   : > { %v867_v48 = vsub.f32 0.0, %v2065_v22  ;;  %v880_v7 = vsel %vm377_vm1, %v862_v5, -inf  ;;  %v703_v15 = vsel %vm377_vm1, %v2065_v22, -inf }
  0xf7   : > { %v2067_v23 = vpop.f32.mrf.mxu1 }
  0xf8   : > { %v895_v50 = vsel %vm377_vm1, %v867_v48, -inf  ;;  %v865_v52 = vsub.f32 0.0, %v2067_v23 }
  0xf9   : > { %v2069_v24 = vpop.f32.mrf.mxu1 }
  0xfa   : > { %v868_v47 = vsub.f32 0.0, %v2069_v24  ;;  %v889_v54 = vsel %vm377_vm1, %v865_v52, -inf }
  0xfb   : > { %v2071_v25 = vpop.f32.mrf.mxu1 }
  0xfc   : > { %v898_v49 = vsel %vm377_vm1, %v868_v47, -inf  ;;  %v866_v51 = vsub.f32 0.0, %v2071_v25 }
  0xfd   : > { %v2073_v26 = vpop.f32.mrf.mxu1 }
  0xfe   : > { %v871_v27 = vsub.f32 0.0, %v2073_v26  ;;  %v892_v53 = vsel %vm377_vm1, %v866_v51, -inf  ;;  %v715_v10 = vsel %vm377_vm1, %v2073_v26, -inf }
  0xff   : > { %v2076_v28 = vpop.f32.mrf.mxu1 }
 0x100   : > { %v907_v29 = vsel %vm377_vm1, %v871_v27, -inf  ;;  %v869_v30 = vsub.f32 0.0, %v2076_v28  ;;  %v709_v12 = vsel %vm377_vm1, %v2076_v28, -inf }
 0x101   : > { %908 = vmax.xlane.f32.xlu0 %v907_v29  ;;  %v2082_v31 = vpop.f32.mrf.mxu1  ;;  %v697_v29 = vsel %vm377_vm1, %v2067_v23, -inf }
 0x102   : > { %v872_v32 = vsub.f32 0.0, %v2082_v31  ;;  %v901_v34 = vsel %vm377_vm1, %v869_v30, -inf  ;;  %v718_v13 = vsel %vm377_vm1, %v2082_v31, -inf }
 0x103   : > { %v2085_v33 = vpop.f32.mrf.mxu1 }
 0x104   : > { %v910_v35 = vsel %vm377_vm1, %v872_v32, -inf  ;;  %v870_v36 = vsub.f32 0.0, %v2085_v33  ;;  %v712_v17 = vsel %vm377_vm1, %v2085_v33, -inf }
 0x105   : > { %902 = vmax.xlane.f32.xlu0 %v901_v34  ;;  %911 = vmax.xlane.f32.xlu1 %v910_v35  ;;  %v2094_v37 = vpop.f32.mrf.mxu1  ;;  %v706_v34 = vsel %vm377_vm1, %v2069_v24, -inf  ;;  %v691_v35 = vsel %vm377_vm1, %v2057_v18, -inf }
 0x106   : > { %v875_v38 = vsub.f32 0.0, %v2094_v37  ;;  %v904_v40 = vsel %vm377_vm1, %v870_v36, -inf  ;;  %v727_v6 = vsel %vm377_vm1, %v2094_v37, -inf }
 0x107   : > { %v2097_v39 = vpop.f32.mrf.mxu1 }
 0x108   : > { %v919_v41 = vsel %vm377_vm1, %v875_v38, -inf  ;;  %v873_v42 = vsub.f32 0.0, %v2097_v39  ;;  %v721_v8 = vsel %vm377_vm1, %v2097_v39, -inf }
 0x109   : > { %905 = vmax.xlane.f32.xlu1 %v904_v40  ;;  %920 = vmax.xlane.f32.xlu0 %v919_v41  ;;  %v2106_v43 = vpop.f32.mrf.mxu1  ;;  %v700_v40 = vsel %vm377_vm1, %v2071_v25, -inf  ;;  %v422_v41 = vsel %vm377_vm1, %v2053_v14, -inf }
 0x10a   : > { %v876_v44 = vsub.f32 0.0, %v2106_v43  ;;  %v913_v45 = vsel %vm377_vm1, %v873_v42, -inf  ;;  %v730_v9 = vsel %vm377_vm1, %v2106_v43, -inf }
 0x10b   : > { %v2133_v57 = vpop.f32.mrf.mxu1 }
 0x10c   : > { %v922_v46 = vsel %vm377_vm1, %v876_v44, -inf  ;;  %v874_v58 = vsub.f32 0.0, %v2133_v57  ;;  %v724_v11 = vsel %vm377_vm1, %v2133_v57, -inf }
 0x10d   : > { %914 = vmax.xlane.f32.xlu1 %v913_v45  ;;  %923 = vmax.xlane.f32.xlu0 %v922_v46  ;;  %v694_v45 = vsel %vm377_vm1, %v2061_v20, -inf  ;;  %v685_v46 = vsel %vm377_vm1, %v2059_v19, -inf }
 0x10e   : > { %v916_v63 = vsel %vm377_vm1, %v874_v58, -inf }
 0x111   : > { %899 = vmax.xlane.f32.xlu1 %v898_v49  ;;  %896 = vmax.xlane.f32.xlu0 %v895_v50  ;;  %v425_v49 = vsel %vm377_vm1, %v2055_v16, -inf  ;;  %v688_v50 = vsel %vm377_vm1, %v2063_v21, -inf }
 0x115   : > { %893 = vmax.xlane.f32.xlu1 %v892_v53  ;;  %890 = vmax.xlane.f32.xlu0 %v889_v54 }
 0x119   : > { %887 = vmax.xlane.f32.xlu1 %v886_v59  ;;  %884 = vmax.xlane.f32.xlu0 %v883_v60 }
 0x11d   : > { %447 = vmax.xlane.f32.xlu0 %v446_v62  ;;  %917 = vmax.xlane.f32.xlu1 %v916_v63 }
 0x121   : > { %878 = vmax.xlane.f32.xlu0 %v877_v3  ;;  %450 = vmax.xlane.f32.xlu1 %v449_v4 }
 0x125   : > { %728 = vmax.xlane.f32.xlu0 %v727_v6  ;;  %881 = vmax.xlane.f32.xlu1 %v880_v7 }
 0x129   : > { %722 = vmax.xlane.f32.xlu0 %v721_v8  ;;  %731 = vmax.xlane.f32.xlu1 %v730_v9 }
 0x12d   : > { %716 = vmax.xlane.f32.xlu0 %v715_v10  ;;  %725 = vmax.xlane.f32.xlu1 %v724_v11 }
 0x131   : > { %710 = vmax.xlane.f32.xlu0 %v709_v12  ;;  %719 = vmax.xlane.f32.xlu1 %v718_v13 }
 0x135   : > { %704 = vmax.xlane.f32.xlu0 %v703_v15  ;;  %713 = vmax.xlane.f32.xlu1 %v712_v17 }
 0x139   : > { %698 = vmax.xlane.f32.xlu0 %v697_v29  ;;  %707 = vmax.xlane.f32.xlu1 %v706_v34 }
 0x13d   : > { %692 = vmax.xlane.f32.xlu0 %v691_v35  ;;  %701 = vmax.xlane.f32.xlu1 %v700_v40 }
 0x141   : > { %423 = vmax.xlane.f32.xlu0 %v422_v41  ;;  %695 = vmax.xlane.f32.xlu1 %v694_v45 }
 0x145   : > { %686 = vmax.xlane.f32.xlu0 %v685_v46  ;;  %426 = vmax.xlane.f32.xlu1 %v425_v49 }
 0x149   : > { %689 = vmax.xlane.f32.xlu1 %v688_v50 }
 0x18a   : > { %v909_v53 = vpop.xlane.xlu0 %908 }
 0x18e   : > { %v903_v54 = vpop.xlane.xlu0 %902  ;;  %v912_v59 = vpop.xlane.xlu1 %911 }
 0x192   : > { %v906_v60 = vpop.xlane.xlu1 %905  ;;  %v921_v62 = vpop.xlane.xlu0 %920 }
 0x196   : > { %v2197_v63 = vpop.xlane.xlu1 %914  ;;  %v2199_v3 = vpop.xlane.xlu0 %923 }
 0x19a   : > { %v900_v4 = vpop.xlane.xlu1 %899  ;;  %v897_v6 = vpop.xlane.xlu0 %896 }
 0x19b   : > { %v931_v45 = vsub.f32 %v867_v48, %v897_v6 }
 0x19e   : > { %v894_v7 = vpop.xlane.xlu1 %893  ;;  %v891_v8 = vpop.xlane.xlu0 %890 }
 0x1a2   : > { %v888_v9 = vpop.xlane.xlu1 %887  ;;  %v885_v10 = vpop.xlane.xlu0 %884 }
 0x1a3   : > { %v927_v11 = vsub.f32 %v863_v56, %v885_v10  ;;  %v928_v34 = vsub.f32 %v864_v55, %v888_v9  ;;  %v953_v9 = vmul.f32 1.442695, %v931_v45 }
 0x1a5   : > { %v945_v17 = vmul.f32 1.442695, %v927_v11  ;;  %v947_v49 = vmul.f32 1.442695, %v928_v34  ;;  %v935_v11 = vsub.f32 %v871_v27, %v909_v53  ;;  %v936_v53 = vsub.f32 %v872_v32, %v912_v59 }
 0x1a6   : > { %v448_v12 = vpop.xlane.xlu0 %447  ;;  %v2203_v13 = vpop.xlane.xlu1 %917  ;;  %v939_v34 = vsub.f32 %v875_v38, %v921_v62 }
 0x1a7   : > { %v452_v15 = vsub.f32 %v444_v61, %v448_v12 }
 0x1a8   : > { %v969_v38 = vmul.f32 1.442695, %v939_v34 }
 0x1a9   : > { %v454_v29 = vmul.f32 1.442695, %v452_v15 }
 0x1aa   : > { %v879_v35 = vpop.xlane.xlu0 %878  ;;  %v451_v40 = vpop.xlane.xlu1 %450 }
 0x1ab   : > { %1673 = vpow2.f32 %v454_v29  ;;  %v925_v41 = vsub.f32 %v861_v1, %v879_v35  ;;  %v453_v56 = vsub.f32 %v445_v2, %v451_v40  ;;  %v929_v1 = vsub.f32 %v865_v52, %v891_v8 }
 0x1ac   : > { %1675 = vpow2.f32 %v945_v17  ;;  %v932_v2 = vsub.f32 %v868_v47, %v900_v4  ;;  %v961_v8 = vmul.f32 1.442695, %v935_v11  ;;  %v933_v47 = vsub.f32 %v869_v30, %v903_v54 }
 0x1ad   : > { %v941_v46 = vmul.f32 1.442695, %v925_v41  ;;  %v456_v61 = vmul.f32 1.442695, %v453_v56  ;;  %v949_v12 = vmul.f32 1.442695, %v929_v1  ;;  %v934_v40 = vsub.f32 %v870_v36, %v906_v60 }
 0x1ae   : > { %v729_v50 = vpop.xlane.xlu0 %728  ;;  %v882_v10 = vpop.xlane.xlu1 %881  ;;  %v955_v15 = vmul.f32 1.442695, %v932_v2  ;;  %v957_v29 = vmul.f32 1.442695, %v933_v47  ;;  %v963_v35 = vmul.f32 1.442695, %v936_v53  ;;  %v940_v1 = vsub.f32 %v876_v44, %v2199_v3 }
 0x1af   : > { %v926_v55 = vsub.f32 %v862_v5, %v882_v10  ;;  %1677 = vpow2.f32 %v456_v61  ;;  %v930_v5 = vsub.f32 %v866_v51, %v894_v7  ;;  %v747_v62 = vsub.f32 %v2094_v37, %v729_v50 }
 0x1b0   : > { %1679 = vpow2.f32 %v941_v46  ;;  %v959_v36 = vmul.f32 1.442695, %v934_v40  ;;  %v937_v37 = vsub.f32 %v873_v42, %v2197_v63 }
 0x1b1   : > { %1681 = vpow2.f32 %v947_v49  ;;  %v943_v48 = vmul.f32 1.442695, %v926_v55  ;;  %v951_v51 = vmul.f32 1.442695, %v930_v5  ;;  %v777_v50 = vmul.f32 1.442695, %v747_v62 }
 0x1b2   : > { %v2221_v6 = vpop.xlane.xlu0 %722  ;;  %1683 = vpow2.f32 %v953_v9  ;;  %v732_v56 = vpop.xlane.xlu1 %731  ;;  %v965_v42 = vmul.f32 1.442695, %v937_v37 }
 0x1b3   : > { %1685 = vpow2.f32 %v943_v48  ;;  %v748_v60 = vsub.f32 %v2106_v43, %v732_v56  ;;  %v745_v63 = vsub.f32 %v2097_v39, %v2221_v6  ;;  %v971_v43 = vmul.f32 1.442695, %v940_v1 }
 0x1b4   : > { %1687 = vpow2.f32 %v949_v12 }
 0x1b5   : > { %1689 = vpow2.f32 %v955_v15  ;;  %v779_v2 = vmul.f32 1.442695, %v748_v60 }
 0x1b6   : > { %v2229_v52 = vpop.xlane.xlu0 %716  ;;  %1691 = vpow2.f32 %v961_v8  ;;  %v726_v12 = vpop.xlane.xlu1 %725 }
 0x1b7   : > { %1693 = vpow2.f32 %v951_v51  ;;  %v746_v44 = vsub.f32 %v2133_v57, %v726_v12  ;;  %v743_v39 = vsub.f32 %v2073_v26, %v2229_v52 }
 0x1b8   : > { %v2227_v17 = vpop.eup %1673  ;;  %1695 = vpow2.f32 %v957_v29  ;;  %v938_v29 = vsub.f32 %v874_v58, %v2203_v13 }
 0x1b9   : > { %v458_v4 = vsel %vm377_vm1, %v2227_v17, 0.0  ;;  %v2235_v27 = vpop.eup %1675  ;;  %1697 = vpow2.f32 %v963_v35  ;;  %v775_v34 = vmul.f32 1.442695, %v746_v44  ;;  %v769_v52 = vmul.f32 1.442695, %v743_v39 }
 0x1ba   : > { %459 = vadd.xlane.f32.xlu0 %v458_v4  ;;  %v979_v30 = vsel %vm377_vm1, %v2235_v27, 0.0  ;;  %v2249_v32 = vpop.xlane.xlu0 %710  ;;  %1699 = vpow2.f32 %v969_v38  ;;  %v773_v4 = vmul.f32 1.442695, %v745_v63  ;;  %v720_v6 = vpop.xlane.xlu1 %719  ;;  %v967_v58 = vmul.f32 1.442695, %v938_v29 }
 0x1bb   : > { %1701 = vpow2.f32 %v959_v36  ;;  %v741_v40 = vsub.f32 %v2076_v28, %v2249_v32  ;;  %v744_v13 = vsub.f32 %v2082_v31, %v720_v6 }
 0x1bc   : > { %v2239_v7 = vpop.eup %1677  ;;  %1703 = vpow2.f32 %v777_v50 }
 0x1bd   : > { %v2245_v54 = vpop.eup %1679  ;;  %v461_v59 = vsel %vm377_vm1, %v2239_v7, 0.0  ;;  %1705 = vpow2.f32 %v779_v2  ;;  %v771_v60 = vmul.f32 1.442695, %v744_v13 }
 0x1be   : > { %980 = vadd.xlane.f32.xlu0 %v979_v30  ;;  %v2253_v41 = vpop.eup %1681  ;;  %462 = vadd.xlane.f32.xlu1 %v461_v59  ;;  %v973_v45 = vsel %vm377_vm1, %v2245_v54, 0.0  ;;  %v2265_v10 = vpop.xlane.xlu0 %704  ;;  %1707 = vpow2.f32 %v965_v42 }
 0x1bf   : > { %v2258_v46 = vpop.eup %1683  ;;  %v982_v61 = vsel %vm377_vm1, %v2253_v41, 0.0  ;;  %1709 = vpow2.f32 %v971_v43  ;;  %v714_v62 = vpop.xlane.xlu1 %713 }
 0x1c0   : > { %v2263_v49 = vpop.eup %1685  ;;  %v991_v55 = vsel %vm377_vm1, %v2258_v46, 0.0  ;;  %1711 = vpow2.f32 %v773_v4  ;;  %v742_v31 = vsub.f32 %v2085_v33, %v714_v62  ;;  %v739_v33 = vsub.f32 %v2065_v22, %v2265_v10 }
 0x1c1   : > { %v2272_v9 = vpop.eup %1687  ;;  %v976_v48 = vsel %vm377_vm1, %v2263_v49, 0.0  ;;  %1713 = vpow2.f32 %v775_v34 }
 0x1c2   : > { %974 = vadd.xlane.f32.xlu0 %v973_v45  ;;  %983 = vadd.xlane.f32.xlu1 %v982_v61  ;;  %v2279_v11 = vpop.eup %1689  ;;  %v985_v15 = vsel %vm377_vm1, %v2272_v9, 0.0  ;;  %v699_v3 = vpop.xlane.xlu0 %698  ;;  %1715 = vpow2.f32 %v769_v52  ;;  %v765_v45 = vmul.f32 1.442695, %v741_v40  ;;  %v767_v12 = vmul.f32 1.442695, %v742_v31 }
 0x1c3   : > { %v2285_v5 = vpop.eup %1691  ;;  %v994_v8 = vsel %vm377_vm1, %v2279_v11, 0.0  ;;  %v737_v28 = vsub.f32 %v2067_v23, %v699_v3  ;;  %1717 = vpow2.f32 %v967_v58  ;;  %v708_v23 = vpop.xlane.xlu1 %707  ;;  %v761_v44 = vmul.f32 1.442695, %v739_v33 }
 0x1c4   : > { %v2290_v47 = vpop.eup %1693  ;;  %v1003_v53 = vsel %vm377_vm1, %v2285_v5, 0.0  ;;  %1719 = vpow2.f32 %v765_v45  ;;  %v740_v3 = vsub.f32 %v2069_v24, %v708_v23 }
 0x1c5   : > { %v2296_v51 = vpop.eup %1695  ;;  %v988_v30 = vsel %vm377_vm1, %v2290_v47, 0.0  ;;  %1721 = vpow2.f32 %v771_v60 }
 0x1c6   : > { %992 = vadd.xlane.f32.xlu0 %v991_v55  ;;  %977 = vadd.xlane.f32.xlu1 %v976_v48  ;;  %v2303_v35 = vpop.eup %1697  ;;  %v2305_v26 = vpop.xlane.xlu0 %692  ;;  %v997_v59 = vsel %vm377_vm1, %v2296_v51, 0.0  ;;  %v757_v55 = vmul.f32 1.442695, %v737_v28  ;;  %v763_v6 = vmul.f32 1.442695, %v740_v3 }
 0x1c7   : > { %v2311_v57 = vpop.eup %1699  ;;  %v1006_v56 = vsel %vm377_vm1, %v2303_v35, 0.0  ;;  %v735_v52 = vsub.f32 %v2057_v18, %v2305_v26 }
 0x1c8   : > { %v2316_v38 = vpop.eup %1701  ;;  %v1015_v32 = vsel %vm377_vm1, %v2311_v57, 0.0  ;;  %1723 = vpow2.f32 %v757_v55 }
 0x1c9   : > { %v2321_v36 = vpop.eup %1703  ;;  %v1000_v37 = vsel %vm377_vm1, %v2316_v38, 0.0  ;;  %1725 = vpow2.f32 %v767_v12  ;;  %v753_v62 = vmul.f32 1.442695, %v735_v52 }
 0x1ca   : > { %986 = vadd.xlane.f32.xlu0 %v985_v15  ;;  %995 = vadd.xlane.f32.xlu1 %v994_v8  ;;  %v424_v61 = vpop.xlane.xlu0 %423  ;;  %v2326_v50 = vpop.eup %1705  ;;  %v823_v2 = vsel %vm377_vm1, %v2321_v36, 0.0 }
 0x1cb   : > { %v428_v1 = vsub.f32 %v2053_v14, %v424_v61  ;;  %v2331_v48 = vpop.eup %1707  ;;  %v826_v42 = vsel %vm377_vm1, %v2326_v50, 0.0  ;;  %v702_v8 = vpop.xlane.xlu1 %701 }
 0x1cc   : > { %v2337_v63 = vpop.eup %1709  ;;  %v1009_v14 = vsel %vm377_vm1, %v2331_v48, 0.0 }
 0x1cd   : > { %v430_v15 = vmul.f32 1.442695, %v428_v1  ;;  %v2341_v43 = vpop.eup %1711  ;;  %v1018_v22 = vsel %vm377_vm1, %v2337_v63, 0.0 }
 0x1ce   : > { %1004 = vadd.xlane.f32.xlu0 %v1003_v53  ;;  %989 = vadd.xlane.f32.xlu1 %v988_v30  ;;  %v2346_v10 = vpop.eup %1713  ;;  %v817_v4 = vsel %vm377_vm1, %v2341_v43, 0.0  ;;  %v738_v53 = vsub.f32 %v2071_v25, %v702_v8 }
 0x1cf   : > { %1727 = vpow2.f32 %v430_v15  ;;  %v2350_v39 = vpop.eup %1715  ;;  %v820_v24 = vsel %vm377_vm1, %v2346_v10, 0.0  ;;  %v696_v58 = vpop.xlane.xlu1 %695 }
 0x1d0   : > { %1729 = vpow2.f32 %v761_v44  ;;  %v2355_v29 = vpop.eup %1717  ;;  %v811_v34 = vsel %vm377_vm1, %v2350_v39, 0.0  ;;  %v759_v40 = vmul.f32 1.442695, %v738_v53  ;;  %v736_v45 = vsub.f32 %v2061_v20, %v696_v58  ;;  %v2406_v44 = vpop.xlane.xlu0 %686 }
 0x1d1   : > { %v2359_v30 = vpop.eup %1719  ;;  %1731 = vpow2.f32 %v763_v6  ;;  %v1012_v25 = vsel %vm377_vm1, %v2355_v29, 0.0 }
 0x1d2   : > { %998 = vadd.xlane.f32.xlu0 %v997_v59  ;;  %1007 = vadd.xlane.f32.xlu1 %v1006_v56  ;;  %v2365_v59 = vpop.eup %1721  ;;  %v805_v13 = vsel %vm377_vm1, %v2359_v30, 0.0  ;;  %1733 = vpow2.f32 %v759_v40  ;;  %v755_v60 = vmul.f32 1.442695, %v736_v45 }
 0x1d3   : > { %v814_v18 = vsel %vm377_vm1, %v2365_v59, 0.0  ;;  %1735 = vpow2.f32 %v753_v62 }
 0x1d4   : > { %1737 = vpow2.f32 %v755_v60 }
 0x1d5   : > { %v2369_v56 = vpop.eup %1723 }
 0x1d6   : > { %1016 = vadd.xlane.f32.xlu0 %v1015_v32  ;;  %1001 = vadd.xlane.f32.xlu1 %v1000_v37  ;;  %v2374_v26 = vpop.eup %1725  ;;  %v793_v28 = vsel %vm377_vm1, %v2369_v56, 0.0 }
 0x1d7   : > { %v808_v31 = vsel %vm377_vm1, %v2374_v26, 0.0 }
 0x1da   : > { %824 = vadd.xlane.f32.xlu0 %v823_v2  ;;  %827 = vadd.xlane.f32.xlu1 %v826_v42 }
 0x1dc   : > { %v2378_v32 = vpop.eup %1727 }
 0x1dd   : > { %v2382_v61 = vpop.eup %1729  ;;  %v434_v20 = vsel %vm377_vm1, %v2378_v32, 0.0 }
 0x1de   : > { %1010 = vadd.xlane.f32.xlu0 %v1009_v14  ;;  %1019 = vadd.xlane.f32.xlu1 %v1018_v22  ;;  %v799_v37 = vsel %vm377_vm1, %v2382_v61, 0.0  ;;  %v2388_v55 = vpop.eup %1731  ;;  %v2404_v14 = vpop.xlane.xlu1 %426 }
 0x1df   : > { %v802_v23 = vsel %vm377_vm1, %v2388_v55, 0.0  ;;  %v2392_v1 = vpop.eup %1733 }
 0x1e0   : > { %v796_v2 = vsel %vm377_vm1, %v2392_v1, 0.0  ;;  %v2396_v33 = vpop.eup %1735 }
 0x1e1   : > { %v787_v12 = vsel %vm377_vm1, %v2396_v33, 0.0  ;;  %v2400_v42 = vpop.eup %1737 }
 0x1e2   : > { %818 = vadd.xlane.f32.xlu0 %v817_v4  ;;  %821 = vadd.xlane.f32.xlu1 %v820_v24  ;;  %v790_v15 = vsel %vm377_vm1, %v2400_v42, 0.0  ;;  %v2408_v22 = vpop.xlane.xlu1 %689 }
 0x1e6   : > { %812 = vadd.xlane.f32.xlu0 %v811_v34  ;;  %1013 = vadd.xlane.f32.xlu1 %v1012_v25 }
 0x1ea   : > { %806 = vadd.xlane.f32.xlu0 %v805_v13  ;;  %815 = vadd.xlane.f32.xlu1 %v814_v18 }
 0x1ee   : > { %794 = vadd.xlane.f32.xlu0 %v793_v28  ;;  %809 = vadd.xlane.f32.xlu1 %v808_v31 }
 0x1f2   : > { %435 = vadd.xlane.f32.xlu0 %v434_v20  ;;  %800 = vadd.xlane.f32.xlu1 %v799_v37 }
 0x1f6   : > { %803 = vadd.xlane.f32.xlu1 %v802_v23 }
 0x1fa   : > { %797 = vadd.xlane.f32.xlu1 %v796_v2 }
 0x1fe   : > { %788 = vadd.xlane.f32.xlu1 %v787_v12 }
 0x202   : > { %791 = vadd.xlane.f32.xlu1 %v790_v15 }
 0x243   : > { %v460_v3 = vpop.xlane.xlu0 %459 }
 0x244   : > { %1739 = vrcp.f32 %v460_v3 }
 0x247   : > { %v981_v8 = vpop.xlane.xlu0 %980  ;;  %v463_v4 = vpop.xlane.xlu1 %462 }
 0x248   : > { %1741 = vrcp.f32 %v463_v4 }
 0x249   : > { %1743 = vrcp.f32 %v981_v8 }
 0x24b   : > { %v975_v6 = vpop.xlane.xlu0 %974  ;;  %v984_v53 = vpop.xlane.xlu1 %983 }
 0x24c   : > { %1745 = vrcp.f32 %v984_v53 }
 0x24d   : > { %1747 = vrcp.f32 %v975_v6 }
 0x24f   : > { %v993_v24 = vpop.xlane.xlu0 %992  ;;  %v978_v34 = vpop.xlane.xlu1 %977 }
 0x250   : > { %1749 = vrcp.f32 %v978_v34 }
 0x251   : > { %1751 = vrcp.f32 %v993_v24  ;;  %v1740_v40 = vpop.eup %1739 }
 0x252   : > { %v2411_v62 = vmul.f32 %v1740_v40, %v2227_v17 }
 0x253   : > { %v987_v52 = vpop.xlane.xlu0 %986  ;;  %v996_v25 = vpop.xlane.xlu1 %995 }
 0x254   : > { %1753 = vrcp.f32 %v996_v25 }
 0x255   : > { %v1742_v58 = vpop.eup %1741  ;;  %1755 = vrcp.f32 %v987_v52 }
 0x256   : > { %v2414_v45 = vmul.f32 %v1742_v58, %v2239_v7  ;;  %v1744_v18 = vpop.eup %1743 }
 0x257   : > { %v1005_v13 = vpop.xlane.xlu0 %1004  ;;  %v990_v28 = vpop.xlane.xlu1 %989  ;;  %v2419_v37 = vmul.f32 %v1744_v18, %v2235_v27 }
 0x258   : > { %1757 = vrcp.f32 %v990_v28  ;;  %v1649_v60 = vpack.i.bf16 %v2414_v45, %v2411_v62 }
 0x259   : > { %v1746_v31 = vpop.eup %1745  ;;  %1759 = vrcp.f32 %v1005_v13 }
 0x25a   : > { %v2422_v23 = vmul.f32 %v1746_v31, %v2253_v41  ;;  %v1748_v17 = vpop.eup %1747 }
 0x25b   : > { %v999_v20 = vpop.xlane.xlu0 %998  ;;  %v1008_v2 = vpop.xlane.xlu1 %1007  ;;  %v2427_v15 = vmul.f32 %v1748_v17, %v2245_v54 }
 0x25c   : > { %1761 = vrcp.f32 %v1008_v2  ;;  %v1644_v7 = vpack.i.bf16 %v2422_v23, %v2419_v37 }
 0x25d   : > { %v1750_v12 = vpop.eup %1749  ;;  %1763 = vrcp.f32 %v999_v20 }
 0x25e   : > { %v2430_v3 = vmul.f32 %v1750_v12, %v2263_v49  ;;  %v1752_v8 = vpop.eup %1751 }
 0x25f   : > { %v1017_v27 = vpop.xlane.xlu0 %1016  ;;  %v1002_v4 = vpop.xlane.xlu1 %1001  ;;  %v1043_v53 = vmul.f32 %v1752_v8, %v2258_v46 }
 0x260   : > { %1765 = vrcp.f32 %v1002_v4  ;;  %v1654_v41 = vpack.i.bf16 %v2430_v3, %v2427_v15 }
 0x261   : > { %v1754_v6 = vpop.eup %1753  ;;  %1767 = vrcp.f32 %v1017_v27 }
 0x262   : > { %v1044_v24 = vmul.f32 %v1754_v6, %v2279_v11  ;;  %v1756_v34 = vpop.eup %1755 }
 0x263   : > { %v2436_v52 = vpop.xlane.xlu1 %827  ;;  %v2438_v25 = vpop.xlane.xlu0 %824  ;;  %v1041_v49 = vmul.f32 %v1756_v34, %v2272_v9 }
 0x264   : > { %v1634_v54 = vpack.i.bf16 %v1044_v24, %v1043_v53 }
 0x265   : > { %v1758_v40 = vpop.eup %1757 }
 0x266   : > { %v1042_v58 = vmul.f32 %v1758_v40, %v2290_v47  ;;  %v1760_v13 = vpop.eup %1759 }
 0x267   : > { %v1020_v18 = vpop.xlane.xlu1 %1019  ;;  %v1047_v46 = vmul.f32 %v1760_v13, %v2285_v5  ;;  %v1011_v17 = vpop.xlane.xlu0 %1010 }
 0x268   : > { %1769 = vrcp.f32 %v1020_v18  ;;  %v1639_v28 = vpack.i.bf16 %v1042_v58, %v1041_v49  ;;  %v733_v49 = vsub.f32 %v2059_v19, %v2406_v44  ;;  %v429_v18 = vsub.f32 %v2055_v16, %v2404_v14 }
 0x269   : > { %v1762_v31 = vpop.eup %1761  ;;  %1771 = vrcp.f32 %v1011_v17 }
 0x26a   : > { %v1048_v11 = vmul.f32 %v1762_v31, %v2303_v35  ;;  %v1764_v20 = vpop.eup %1763  ;;  %v749_v13 = vmul.f32 1.442695, %v733_v49  ;;  %v432_v31 = vmul.f32 1.442695, %v429_v18 }
 0x26b   : > { %v822_v2 = vpop.xlane.xlu1 %821  ;;  %v1045_v9 = vmul.f32 %v1764_v20, %v2296_v51  ;;  %v819_v14 = vpop.xlane.xlu0 %818 }
 0x26c   : > { %v1614_v12 = vpack.i.bf16 %v1048_v11, %v1047_v46 }
 0x26d   : > { %v1766_v8 = vpop.eup %1765 }
 0x26e   : > { %1615 = vrot.lane.b32.xlu0 %v1614_v12, %s1913_s20  ;;  %v1046_v47 = vmul.f32 %v1766_v8, %v2316_v38  ;;  %v1768_v5 = vpop.eup %1767 }
 0x26f   : > { %v1014_v27 = vpop.xlane.xlu1 %1013  ;;  %v1051_v6 = vmul.f32 %v1768_v5, %v2311_v57  ;;  %v734_v57 = vsub.f32 %v2063_v21, %v2408_v22  ;;  %v813_v46 = vpop.xlane.xlu0 %812 }
 0x270   : > { %1773 = vrcp.f32 %v1014_v27  ;;  %v1619_v4 = vpack.i.bf16 %v1046_v47, %v1045_v9 }
 0x271   : > { %1775 = vpow2.f32 %v749_v13 }
 0x272   : > { %1620 = vrot.lane.b32.xlu1 %v1619_v4, %s1913_s20 }
 0x273   : > { %v816_v16 = vpop.xlane.xlu1 %815  ;;  %v807_v37 = vpop.xlane.xlu0 %806 }
 0x275   : > { %v1770_v35 = vpop.eup %1769 }
 0x276   : > { %v1052_v53 = vmul.f32 %v1770_v35, %v2337_v63  ;;  %v1772_v34 = vpop.eup %1771  ;;  %v751_v63 = vmul.f32 1.442695, %v734_v57 }
 0x277   : > { %v1049_v51 = vmul.f32 %v1772_v34, %v2331_v48 }
 0x278   : > { %v1624_v24 = vpack.i.bf16 %v1052_v53, %v1051_v6  ;;  %1777 = vpow2.f32 %v751_v63 }
 0x279   : > { %1779 = vpow2.f32 %v432_v31 }
 0x27a   : > { %1625 = vrot.lane.b32.xlu0 %v1624_v24, %s1913_s20  ;;  %1781 = vrcp.f32 %v2438_v25 }
 0x27b   : > { %1783 = vrcp.f32 %v2436_v52 }
 0x27c   : > { %1785 = vrcp.f32 %v819_v14 }
 0x27d   : > { %v1774_v40 = vpop.eup %1773  ;;  %1787 = vrcp.f32 %v822_v2 }
 0x27e   : > { %v1050_v38 = vmul.f32 %v1774_v40, %v2355_v29  ;;  %v2460_v48 = vpop.eup %1775  ;;  %1789 = vrcp.f32 %v813_v46 }
 0x27f   : > { %v781_v19 = vsel %vm377_vm1, %v2460_v48, 0.0  ;;  %1791 = vrcp.f32 %v816_v16 }
 0x280   : > { %v1629_v58 = vpack.i.bf16 %v1050_v38, %v1049_v51  ;;  %1793 = vrcp.f32 %v807_v37 }
 0x282   : > { %1630 = vrot.lane.b32.xlu1 %v1629_v58, %s1913_s20 }
 0x285   : > { %v2464_v29 = vpop.eup %1777 }
 0x286   : > { %v784_v44 = vsel %vm377_vm1, %v2464_v29, 0.0  ;;  %v2468_v21 = vpop.eup %1779 }
 0x287   : > { %v437_v22 = vsel %vm377_vm1, %v2468_v21, 0.0  ;;  %v1782_v3 = vpop.eup %1781 }
 0x288   : > { %v859_v17 = vmul.f32 %v1782_v3, %v2321_v36 }
 0x299   : > { %782 = vadd.xlane.f32.xlu0 %v781_v19 }
 0x29d   : > { %785 = vadd.xlane.f32.xlu0 %v784_v44 }
 0x2a6   : > { %438 = vadd.xlane.f32.xlu1 %v437_v22 }
 0x2b3   : > { %1635 = vrot.lane.b32.xlu0 %v1634_v54, %s1913_s20  ;;  %v810_v54 = vpop.xlane.xlu1 %809 }
 0x2b4   : > { %1795 = vrcp.f32 %v810_v54 }
 0x2b7   : > { %1645 = vrot.lane.b32.xlu0 %v1644_v7, %s1913_s20  ;;  %1640 = vrot.lane.b32.xlu1 %v1639_v28, %s1913_s20  ;;  %v2486_v11 = vpop.xlane.xlu1 %800  ;;  %v2492_v7 = vpop.xlane.xlu0 %794 }
 0x2b8   : > { %1797 = vrcp.f32 %v2486_v11 }
 0x2bb   : > { %1655 = vrot.lane.b32.xlu0 %v1654_v41, %s1913_s20  ;;  %1650 = vrot.lane.b32.xlu1 %v1649_v60, %s1913_s20  ;;  %v2488_v23 = vpop.xlane.xlu1 %803  ;;  %v2496_v62 = vpop.xlane.xlu0 %435 }
 0x2bc   : > { %v1784_v41 = vpop.eup %1783  ;;  %1799 = vrcp.f32 %v2488_v23 }
 0x2bd   : > { %v860_v12 = vmul.f32 %v1784_v41, %v2326_v50  ;;  %v1786_v9 = vpop.eup %1785 }
 0x2be   : > { %v1788_v5 = vpop.eup %1787  ;;  %v857_v50 = vmul.f32 %v1786_v9, %v2341_v43 }
 0x2bf   : > { %v2494_v15 = vpop.xlane.xlu1 %797  ;;  %v1790_v6 = vpop.eup %1789  ;;  %v858_v34 = vmul.f32 %v1788_v5, %v2346_v10 }
 0x2c0   : > { %v1792_v53 = vpop.eup %1791  ;;  %v855_v57 = vmul.f32 %v1790_v6, %v2350_v39 }
 0x2c1   : > { %v856_v63 = vmul.f32 %v1792_v53, %v2365_v59  ;;  %v1794_v44 = vpop.eup %1793 }
 0x2c2   : > { %v1796_v22 = vpop.eup %1795  ;;  %v853_v39 = vmul.f32 %v1794_v44, %v2359_v30 }
 0x2c3   : > { %v2498_v45 = vpop.xlane.xlu1 %788  ;;  %v854_v59 = vmul.f32 %v1796_v22, %v2374_v26 }
 0x2c4   : > { %1801 = vrcp.f32 %v2498_v45 }
 0x2c7   : > { %v2500_v28 = vpop.xlane.xlu1 %791 }
 0x2c8   : > { %1803 = vrcp.f32 %v2500_v28 }
 0x2c9   : > { %1805 = vrcp.f32 %v2492_v7 }
 0x2ca   : > { %1807 = vrcp.f32 %v2494_v15 }
 0x2cb   : > { %1809 = vrcp.f32 %v2496_v62 }
 0x2e0   : > { %v1616_v60 = vpop.permute.xlu0 %1615 }
 0x2e1   : > { %v1618_v40 = vunpack.i.h.bf16 %v1616_v60  ;;  %v1617_v51 = vunpack.i.l.bf16 %v1616_v60 }
 0x2e3   : > { %v1127_v43 = vsel %vm377_vm1, %v855_v57, %v1617_v51  ;;  %v1128_v10 = vsel %vm377_vm1, %v856_v63, %v1618_v40 }
 0x2e4   : > { %v1621_v47 = vpop.permute.xlu1 %1620  ;;  %v1143_v14 = vmax.f32 %v1127_v43, 1e-12  ;;  %v1144_v54 = vmax.f32 %v1128_v10, 1e-12 }
 0x2e5   : > { %v1623_v46 = vunpack.i.h.bf16 %v1621_v47  ;;  %v1622_v37 = vunpack.i.l.bf16 %v1621_v47 }
 0x2e6   : > { %v1154_v60 = vpack.c.bf16 %v1144_v54, %v1143_v14 }
 0x2e7   : > { %v1125_v3 = vsel %vm377_vm1, %v853_v39, %v1622_v37  ;;  %v1126_v41 = vsel %vm377_vm1, %v854_v59, %v1623_v46 }
 0x2ec   : > { %v1626_v25 = vpop.permute.xlu0 %1625 }
 0x2ed   : > { %v1628_v20 = vunpack.i.h.bf16 %v1626_v25  ;;  %v1627_v52 = vunpack.i.l.bf16 %v1626_v25  ;;  %v1184_v25 = vsel %vm1164_vm2, %v1154_v60, 0 }
 0x2ef   : > { %v1131_v2 = vsel %vm377_vm1, %v859_v17, %v1627_v52  ;;  %v1132_v8 = vsel %vm377_vm1, %v860_v12, %v1628_v20  ;;  %v1141_v20 = vmax.f32 %v1125_v3, 1e-12  ;;  %v1142_v52 = vmax.f32 %v1126_v41, 1e-12 }
 0x2f0   : > { %v1147_v27 = vmax.f32 %v1131_v2, 1e-12  ;;  %v1148_v4 = vmax.f32 %v1132_v8, 1e-12  ;;  %v1798_v2 = vpop.eup %1797 }
 0x2f1   : > { %v1153_v17 = vpack.c.bf16 %v1142_v52, %v1141_v20  ;;  %v1800_v8 = vpop.eup %1799  ;;  %v851_v23 = vmul.f32 %v1798_v2, %v2382_v61 }
 0x2f2   : > { %v1156_v35 = vpack.c.bf16 %v1148_v4, %v1147_v27  ;;  %v1802_v47 = vpop.eup %1801  ;;  %v852_v45 = vmul.f32 %v1800_v8, %v2388_v55 }
 0x2f3   : > { %v1181_v12 = vsel %vm1164_vm2, %v1153_v17, 0  ;;  %v1804_v4 = vpop.eup %1803  ;;  %v847_v6 = vmul.f32 %v1802_v47, %v2396_v33 }
 0x2f4   : > { %v1631_v24 = vpop.permute.xlu1 %1630  ;;  %v1190_v36 = vsel %vm1164_vm2, %v1156_v35, 0  ;;  %v1806_v61 = vpop.eup %1805 }
 0x2f5   : > { %v1633_v38 = vunpack.i.h.bf16 %v1631_v24  ;;  %v1632_v49 = vunpack.i.l.bf16 %v1631_v24  ;;  %1519 = vmatpush3.bf16.xpose.msra.mxu0 %v1190_v36  ;;  %v848_v36 = vmul.f32 %v1804_v4, %v2400_v42  ;;  %v849_v33 = vmul.f32 %v1806_v61, %v2369_v56 }
 0x2f6   : > { %1520 = vmatprep.subr.bf16.mxu0 %v1911_v0 }
 0x2f7   : > { %v1129_v58 = vsel %vm377_vm1, %v857_v50, %v1632_v49  ;;  %v1130_v13 = vsel %vm377_vm1, %v858_v34, %v1633_v38  ;;  %v1808_v50 = vpop.eup %1807 }
 0x2f8   : > { %v1145_v18 = vmax.f32 %v1129_v58, 1e-12  ;;  %v1146_v31 = vmax.f32 %v1130_v13, 1e-12  ;;  %v850_v42 = vmul.f32 %v1808_v50, %v2392_v1 }
 0x2fa   : > { %v1155_v19 = vpack.c.bf16 %v1146_v31, %v1145_v18  ;;  %v1810_v18 = vpop.eup %1809 }
 0x2fb   : > { %v442_v22 = vmul.f32 %v1810_v18, %v2378_v32 }
 0x2fc   : > { %v1187_v16 = vsel %vm1164_vm2, %v1155_v19, 0 }
 0x2fd   : > { %1521 = vmatpush3.bf16.xpose.msra.mxu0 %v1187_v16 }
 0x2fe   : > { %1522 = vmatprep.subr.bf16.mxu0 %v1911_v0 }
 0x305   : > { %1523 = vmatpush3.bf16.xpose.msra.mxu0 %v1184_v25 }
 0x306   : > { %1524 = vmatprep.subr.bf16.mxu0 %v1911_v0 }
 0x30d   : > { %1525 = vmatpush3.bf16.xpose.msra.mxu0 %v1181_v12 }
 0x30e   : > { %1526 = vmatprep.subr.bf16.mxu0 %v1911_v0 }
 0x322   : > { %v783_v30 = vpop.xlane.xlu0 %782 }
 0x326   : > { %v786_v26 = vpop.xlane.xlu0 %785 }
 0x327   : > { %1811 = vrcp.f32 %v786_v26 }
 0x328   : > { %1813 = vrcp.f32 %v783_v30 }
 0x32a   : > { %v1636_v9 = vpop.permute.xlu0 %1635 }
 0x32b   : > { %v1638_v27 = vunpack.i.h.bf16 %v1636_v9  ;;  %v1637_v11 = vunpack.i.l.bf16 %v1636_v9 }
 0x32d   : > { %v1123_v28 = vsel %vm377_vm1, %v851_v23, %v1637_v11  ;;  %v1124_v7 = vsel %vm377_vm1, %v852_v45, %v1638_v27 }
 0x32e   : > { %v1646_v15 = vpop.permute.xlu0 %1645  ;;  %v1139_v5 = vmax.f32 %v1123_v28, 1e-12  ;;  %v1140_v35 = vmax.f32 %v1124_v7, 1e-12 }
 0x32f   : > { %v1648_v62 = vunpack.i.h.bf16 %v1646_v15  ;;  %v1647_v53 = vunpack.i.l.bf16 %v1646_v15  ;;  %v439_v24 = vpop.xlane.xlu1 %438 }
 0x330   : > { %1815 = vrcp.f32 %v439_v24  ;;  %v1152_v55 = vpack.c.bf16 %v1140_v35, %v1139_v5 }
 0x331   : > { %v1119_v34 = vsel %vm377_vm1, %v847_v6, %v1647_v53  ;;  %v1120_v40 = vsel %vm377_vm1, %v848_v36, %v1648_v62 }
 0x332   : > { %v1178_v51 = vsel %vm1164_vm2, %v1152_v55, 0  ;;  %v1135_v38 = vmax.f32 %v1119_v34, 1e-12  ;;  %v1136_v49 = vmax.f32 %v1120_v40, 1e-12  ;;  %v1656_v46 = vpop.permute.xlu0 %1655 }
 0x333   : > { %v1641_v58 = vpop.permute.xlu1 %1640  ;;  %1527 = vmatpush3.bf16.xpose.msra.mxu0 %v1178_v51  ;;  %v1658_v41 = vunpack.i.h.bf16 %v1656_v46  ;;  %v1657_v32 = vunpack.i.l.bf16 %v1656_v46 }
 0x334   : > { %v1643_v13 = vunpack.i.h.bf16 %v1641_v58  ;;  %v1642_v57 = vunpack.i.l.bf16 %v1641_v58  ;;  %1528 = vmatprep.subr.bf16.mxu0 %v1911_v0  ;;  %v1150_v63 = vpack.c.bf16 %v1136_v49, %v1135_v38  ;;  %v1812_v14 = vpop.eup %1811 }
 0x335   : > { %v1814_v39 = vpop.eup %1813  ;;  %v846_v59 = vmul.f32 %v1812_v14, %v2464_v29 }
 0x336   : > { %v1121_v31 = vsel %vm377_vm1, %v849_v33, %v1642_v57  ;;  %v1122_v43 = vsel %vm377_vm1, %v850_v42, %v1643_v13  ;;  %v845_v52 = vmul.f32 %v1814_v39, %v2460_v48  ;;  %v1172_v8 = vsel %vm1164_vm2, %v1150_v63, 0 }
 0x337   : > { %v1651_v10 = vpop.permute.xlu1 %1650  ;;  %v1137_v19 = vmax.f32 %v1121_v31, 1e-12  ;;  %v1138_v44 = vmax.f32 %v1122_v43, 1e-12  ;;  %v1118_v17 = vsel %vm377_vm1, %v846_v59, %v1658_v41 }
 0x338   : > { %v1652_v16 = vunpack.i.l.bf16 %v1651_v10  ;;  %v1653_v20 = vunpack.i.h.bf16 %v1651_v10  ;;  %v1117_v30 = vsel %vm377_vm1, %v845_v52, %v1657_v32  ;;  %v1134_v26 = vmax.f32 %v1118_v17, 1e-12 }
 0x339   : > { %v1151_v56 = vpack.c.bf16 %v1138_v44, %v1137_v19 }
 0x33a   : > { %v476_v54 = vsel %vm377_vm1, %v442_v22, %v1652_v16 }
 0x33b   : > { %v478_v37 = vmax.f32 %v476_v54, 1e-12  ;;  %v1175_v1 = vsel %vm1164_vm2, %v1151_v56, 0 }
 0x33c   : > { %1529 = vmatpush3.bf16.xpose.msra.mxu0 %v1175_v1 }
 0x33d   : > { %v1816_v60 = vpop.eup %1815  ;;  %v1459_v3 = vpack.c.bf16 %v478_v37, %v478_v37  ;;  %1530 = vmatprep.subr.bf16.mxu0 %v1911_v0 }
 0x33e   : > { %v443_v25 = vmul.f32 %v1816_v60, %v2468_v21  ;;  %v1133_v21 = vmax.f32 %v1117_v30, 1e-12 }
 0x33f   : > { %489 = vst.msk [vmem:[#allocation2] sm:$0xf] %vm488_vm3, %v1459_v3 }
 0x340   : > { %v477_v29 = vsel %vm377_vm1, %v443_v25, %v1653_v20  ;;  %v1149_v48 = vpack.c.bf16 %v1134_v26, %v1133_v21 }
 0x341   : > { %v479_v12 = vmax.f32 %v477_v29, 1e-12 }
 0x342   : > { %v1169_v9 = vsel %vm1164_vm2, %v1149_v48, 0 }
 0x343   : > { %v1460_v2 = vpack.c.bf16 %v479_v12, %v479_v12 }
 0x344   : > { %1531 = vmatpush3.bf16.xpose.msra.mxu0 %v1172_v8 }
 0x345   : > { %490 = vst.msk [vmem:[#allocation2 + $0x4] sm:$0xf] %vm488_vm3, %v1460_v2  ;;  %1532 = vmatprep.subr.bf16.mxu0 %v1911_v0 }
 0x34c   : > { %1533 = vmatpush3.bf16.xpose.msra.mxu0 %v1169_v9  ;;  %v1672_v47 = vld [vmem:[#allocation2] sm:$0xff]  }
 0x353   : > { %1535 = vmatmul.mubr.msk.bf16.vlgmr.msra.gmra.mxu0 %vm1164_vm2, %v1672_v47 }
 0x413   : > { %v1226_v27 = vpop.f32.mrf.mxu0 }
 0x415   : > { %v1536_v11 = vpop.f32.mrf.mxu0 }
 0x417   : > { %v1229_v23 = vpop.f32.mrf.mxu0 }
 0x418   : > { %v1466_v0 = vpack.c.bf16 %v1229_v23, %v1226_v27 }
 0x419   : > { %v1537_v45 = vpop.f32.mrf.mxu0 }
 0x41a   : > { %1467 = vst [vmem:[%s309_s13] sm:$0xff] %v1466_v0  }
 0x41b   : > { %1830 = shalt.err (!%p1827_p7)
}
 0x41c   : > { %s1831_s23 = scalar_lea.hbm %s2571_s6, 128  ;;  %s1835_s21 = scalar_lea.hbm %s2628_s4, 1024 }
 0x41d   : > { %p1832_p9 = scmp.ne.s32.totalorder %s2571_s6, %s1831_s23  ;;  %p1836_p12 = scmp.lt.s32.totalorder %s2571_s6, %s2628_s4 }
 0x41e   : > { %p1837_p13 = scmp.lt.s32.totalorder %s1835_s21, %s1831_s23 }
 0x41f   : > { %p1833_p10 = pnand %p1832_p9, %p1993_p3 }
 0x420   : > { %p1838_p0 = por %p1837_p13, %p1836_p12 }
 0x421   : > { %p1834_p11 = pneg %p1833_p10 }
 0x423   : > { %p1839_p1 = pnand %p1838_p0, %p1834_p11 }
 0x425   : > { %1842 = shalt.err (!%p1839_p1)
}
 0x426   : > { %s1915_s11 = smov 64   ;;  %s1916_s12 = smov 4  }
 0x427   : > { %1538 = dma.vmem_to_hbm [thread:$0]  (%p1993_p3), %s2566_s24, 128, %s2571_s6, %s2573_s18, %s1915_s11, %s1915_s11, %s1916_s12  }
 0x428 PF: > { %p1544_p2 = scmp.ge.s32.totalorder %s1909_s22, 2  ;;  %s1277_s13 = sand.u32 1, %s1881_s15  }
 0x429   : > { %s1278_s27 = scalar_lea.sflag [#allocation4], %s1277_s13 }
 0x42a   : > { %p1541_p4 = pnand %p1544_p2, %p2002_p8 }
 0x42c   : > { %p1542_p5 = pneg %p1541_p4 }
 0x42e   : > { %1876 = dma.done.wait (%p1542_p5), %s1278_s27, 128  }
 0x42f   : > { %1878 = vsyncadd (%p1542_p5), %s1278_s27, 4294967168  ;;  %s17_s22 = sadd.s32 1, %s1909_s22   ;;  %s2639_s18 = sld [smem:[#allocation6_spill]] }
 0x430   : > { %p14_p6 = scmp.ge.s32.totalorder %s17_s22, 10   ;;  %s2640_s19 = sld [smem:[#allocation7_spill]] }
 0x431   : > { %s2641_s20 = sld [smem:[#allocation8_spill]]  ;;  %s2643_s15 = smov %s1885_s16 }
 0x432   : > { %s2642_s21 = sld [smem:[#allocation9_spill]]  ;;  %s2644_s16 = smov %s1889_s17 }
 0x433   : > { %s2645_s17 = smov %s2011_s7  ;;  %16 = sbr.rel (!%p14_p6) target bundleno = 5 (0x5), region = 84 }
 0x438   :  { %1283 = vsyncpa [#allocation4], 1 }
 0x439   :  { %1285 = vsyncpa [#allocation4 + $0x1], 1 }

</bundles_post_ra>
